<compile_context>
chip_gen: v7x
topology: tpu7x:2x2x1
jax: 0.10.0
libtpu: 0.0.40
codegen_flags: <defaults>
</compile_context>

<pallas_src>
import functools
import math

import jax
import jax.numpy as jnp
from jax import lax
from jax.experimental import pallas as pl
from jax.experimental.pallas import tpu as pltpu


def _mab_kernel(q_ref, k_ref,
                wq_ref, bq_ref, wkv_ref, bkv_ref, wo_ref, bo_ref,
                o_ref,
                *, num_heads, dim_V):
    # Blocks: q_ref (1, Nq, dim_Q), k_ref (1, Nk, dim_K), o_ref (1, Nq, dim_V)
    q_in = q_ref[0].astype(jnp.float32)          # (Nq, dim_Q)
    k_in = k_ref[0].astype(jnp.float32)          # (Nk, dim_K)

    wq = wq_ref[...].astype(jnp.float32)         # (dim_Q, dim_V)
    wkv = wkv_ref[...].astype(jnp.float32)       # (dim_K, 2*dim_V)  [Wk*scale | Wv]
    wo = wo_ref[...].astype(jnp.float32)         # (dim_V, dim_V)
    bq = bq_ref[...].astype(jnp.float32)         # (1, dim_V)
    bkv = bkv_ref[...].astype(jnp.float32)       # (1, 2*dim_V)      [bk*scale | bv]
    bo = bo_ref[...].astype(jnp.float32)         # (1, dim_V)

    # Input projections (MXU, f32 accumulation). K/V share one weight push.
    Q = jnp.dot(q_in, wq, preferred_element_type=jnp.float32) + bq     # (Nq, dim_V)
    KV = jnp.dot(k_in, wkv, preferred_element_type=jnp.float32) + bkv  # (Nk, 2*dim_V)
    K = KV[:, :dim_V]                            # scale already folded in
    V = KV[:, dim_V:]

    ds = dim_V // num_heads

    # Static head loop; each head is a pair of 2-D MXU matmuls on lane slices.
    head_outs = []
    for h in range(num_heads):
        lo = h * ds
        Qh = Q[:, lo:lo + ds]                    # (Nq, ds)
        Kh = K[:, lo:lo + ds]                    # (Nk, ds)
        Vh = V[:, lo:lo + ds]                    # (Nk, ds)

        # scores = Qh @ Kh^T (contract last dims; avoids explicit transpose)
        s = lax.dot_general(Qh, Kh, (((1,), (1,)), ((), ())),
                            preferred_element_type=jnp.float32)        # (Nq, Nk)
        s = s - jnp.max(s, axis=-1, keepdims=True)
        p = jnp.exp(s)                                                 # EUP
        p = p / jnp.sum(p, axis=-1, keepdims=True)                     # softmax

        head_outs.append(jnp.dot(p, Vh, preferred_element_type=jnp.float32))

    # Residual add done once on the full-width tile (concat of Qh slices == Q).
    O = Q + jnp.concatenate(head_outs, axis=-1)  # (Nq, dim_V)

    # O = O + swish(fc_o(O))
    t = jnp.dot(O, wo, preferred_element_type=jnp.float32) + bo
    sig = 1.0 / (1.0 + jnp.exp(-t))              # exact sigmoid via EUP exp
    O = O + t * sig

    o_ref[0] = O.astype(o_ref.dtype)


def mab_forward(Q, K, params, *, num_heads):
    """Pallas MAB forward.  Q: [B, Nq, dim_Q], K: [B, Nk, dim_K] -> [B, Nq, dim_V]."""
    Wq, bq, Wk, bk, Wv, bv, Wo, bo = params
    B, Nq, dim_Q = Q.shape
    _, Nk, dim_K = K.shape
    dim_V = Wq.shape[1]
    assert dim_V % num_heads == 0

    # Fold the 1/sqrt(dim_V) softmax scale into the K projection (K is only
    # ever used in the Q@K^T scores), and fuse K/V projections into one
    # (dim_K, 2*dim_V) weight so the kernel does a single MXU pass over k_in.
    scale = 1.0 / math.sqrt(dim_V)
    Wkv = jnp.concatenate([Wk * scale, Wv], axis=1)          # (dim_K, 2*dim_V)
    bkv = jnp.concatenate([bk * scale, bv]).reshape(1, 2 * dim_V)

    # Biases as (1, dim_V) so they live as lane-dense 2-D VMEM tiles.
    bq2 = bq.reshape(1, dim_V)
    bo2 = bo.reshape(1, dim_V)

    kernel = functools.partial(_mab_kernel, num_heads=num_heads, dim_V=dim_V)

    const2d = lambda shape: pl.BlockSpec(shape, lambda b: (0, 0))

    return pl.pallas_call(
        kernel,
        out_shape=jax.ShapeDtypeStruct((B, Nq, dim_V), Q.dtype),
        grid=(B,),
        in_specs=[
            pl.BlockSpec((1, Nq, dim_Q), lambda b: (b, 0, 0)),   # Q  (per-batch tile)
            pl.BlockSpec((1, Nk, dim_K), lambda b: (b, 0, 0)),   # K  (per-batch tile)
            const2d((dim_Q, dim_V)),                             # Wq (resident)
            const2d((1, dim_V)),                                 # bq
            const2d((dim_K, 2 * dim_V)),                         # [Wk*scale | Wv]
            const2d((1, 2 * dim_V)),                             # [bk*scale | bv]
            const2d((dim_V, dim_V)),                             # Wo
            const2d((1, dim_V)),                                 # bo
        ],
        out_specs=pl.BlockSpec((1, Nq, dim_V), lambda b: (b, 0, 0)),
        compiler_params=pltpu.CompilerParams(
            dimension_semantics=("parallel",)),                  # megacore over batch
    )(Q, K, Wq, bq2, Wkv, bkv, Wo, bo2)


# ----------------------------- reference -----------------------------------
def _swish(x):
    return x * jax.nn.sigmoid(x)


def _mab_reference(Q_in, K_in, params, *, num_heads):
    Wq, bq, Wk, bk, Wv, bv, Wo, bo = params
    dim_V = Wq.shape[1]
    hp = lax.Precision.HIGHEST
    Q = jnp.einsum('bnd,dv->bnv', Q_in, Wq, precision=hp) + bq
    K = jnp.einsum('bnd,dv->bnv', K_in, Wk, precision=hp) + bk
    V = jnp.einsum('bnd,dv->bnv', K_in, Wv, precision=hp) + bv
    # torch: cat(split(x, dim_split, 2), 0)  -> [B*H, N, dim_split]
    Q_ = jnp.concatenate(jnp.split(Q, num_heads, axis=2), axis=0)
    K_ = jnp.concatenate(jnp.split(K, num_heads, axis=2), axis=0)
    V_ = jnp.concatenate(jnp.split(V, num_heads, axis=2), axis=0)
    A = jax.nn.softmax(
        jnp.einsum('bqd,bkd->bqk', Q_, K_, precision=hp) / math.sqrt(dim_V), axis=2)
    O = Q_ + jnp.einsum('bqk,bkd->bqd', A, V_, precision=hp)
    # torch: cat(split(O, B, 0), 2)  -> [B, N, dim_V]
    O = jnp.concatenate(jnp.split(O, num_heads, axis=0), axis=2)
    O = O + _swish(jnp.einsum('bnv,vw->bnw', O, Wo, precision=hp) + bo)
    return O


if __name__ == "__main__":
    key = jax.random.PRNGKey(0)
    keys = jax.random.split(key, 10)

    # Small shapes consistent with a set-transformer readout block.
    B, Nq, Nk = 2, 8, 8
    dim_Q, dim_K = 32, 32
    dim_V, num_heads = 128, 4        # dim_V = 128 -> lane-dense output stores

    Q = jax.random.normal(keys[0], (B, Nq, dim_Q), dtype=jnp.float32)
    K = jax.random.normal(keys[1], (B, Nk, dim_K), dtype=jnp.float32)

    def init_linear(kw, kb, fan_in, fan_out):
        bound = 1.0 / math.sqrt(fan_in)
        W = jax.random.uniform(kw, (fan_in, fan_out), jnp.float32, -bound, bound)
        b = jax.random.uniform(kb, (fan_out,), jnp.float32, -bound, bound)
        return W, b

    Wq, bq = init_linear(keys[2], keys[3], dim_Q, dim_V)
    Wk, bk = init_linear(keys[4], keys[5], dim_K, dim_V)
    Wv, bv = init_linear(keys[6], keys[7], dim_K, dim_V)
    Wo, bo = init_linear(keys[8], keys[9], dim_V, dim_V)
    params = (Wq, bq, Wk, bk, Wv, bv, Wo, bo)

    out = mab_forward(Q, K, params, num_heads=num_heads)
    jax.block_until_ready(out)

    ref = _mab_reference(Q, K, params, num_heads=num_heads)
    assert out.shape == (B, Nq, dim_V)
    assert jnp.allclose(out, ref, atol=2e-3, rtol=2e-3), float(jnp.max(jnp.abs(out - ref)))

    print("KERNEL_OK")
</pallas_src>

<mosaic_0001>
module attributes {stable_mosaic.version = 11 : i64} {
  func.func @_mab_kernel(%arg0: i32, %arg1: memref<1x8x32xf32, #tpu.memory_space<vmem>>, %arg2: memref<1x8x32xf32, #tpu.memory_space<vmem>>, %arg3: memref<32x128xf32, #tpu.memory_space<vmem>>, %arg4: memref<1x128xf32, #tpu.memory_space<vmem>>, %arg5: memref<32x256xf32, #tpu.memory_space<vmem>>, %arg6: memref<1x256xf32, #tpu.memory_space<vmem>>, %arg7: memref<128x128xf32, #tpu.memory_space<vmem>>, %arg8: memref<1x128xf32, #tpu.memory_space<vmem>>, %arg9: memref<1x8x128xf32, #tpu.memory_space<vmem>>) attributes {dimension_semantics = [#tpu.dimension_semantics<parallel>], iteration_bounds = array<i64: 2>, scalar_prefetch = 0 : i64, scratch_operands = 0 : i64, tpu.core_type = #tpu.core_type<tc>, window_params = [{transform_indices = @transform_0, window_bounds = array<i64: 1, 8, 32>}, {transform_indices = @transform_1, window_bounds = array<i64: 1, 8, 32>}, {pipeline_mode = #tpu.pipeline_mode<synchronous>, transform_indices = @transform_2, window_bounds = array<i64: 32, 128>}, {pipeline_mode = #tpu.pipeline_mode<synchronous>, transform_indices = @transform_3, window_bounds = array<i64: 1, 128>}, {pipeline_mode = #tpu.pipeline_mode<synchronous>, transform_indices = @transform_4, window_bounds = array<i64: 32, 256>}, {pipeline_mode = #tpu.pipeline_mode<synchronous>, transform_indices = @transform_5, window_bounds = array<i64: 1, 256>}, {pipeline_mode = #tpu.pipeline_mode<synchronous>, transform_indices = @transform_6, window_bounds = array<i64: 128, 128>}, {pipeline_mode = #tpu.pipeline_mode<synchronous>, transform_indices = @transform_7, window_bounds = array<i64: 1, 128>}, {transform_indices = @transform_8, window_bounds = array<i64: 1, 8, 128>}]} {
    %c0 = arith.constant 0 : index
    %c0_0 = arith.constant 0 : index
    %c0_1 = arith.constant 0 : index
    %0 = vector.load %arg1[%c0, %c0_0, %c0_1] : memref<1x8x32xf32, #tpu.memory_space<vmem>>, vector<1x8x32xf32>
    %1 = vector.shape_cast %0 : vector<1x8x32xf32> to vector<8x32xf32>
    %c0_2 = arith.constant 0 : index
    %c0_3 = arith.constant 0 : index
    %c0_4 = arith.constant 0 : index
    %2 = vector.load %arg2[%c0_2, %c0_3, %c0_4] : memref<1x8x32xf32, #tpu.memory_space<vmem>>, vector<1x8x32xf32>
    %3 = vector.shape_cast %2 : vector<1x8x32xf32> to vector<8x32xf32>
    %c0_5 = arith.constant 0 : index
    %c0_6 = arith.constant 0 : index
    %4 = vector.load %arg3[%c0_5, %c0_6] : memref<32x128xf32, #tpu.memory_space<vmem>>, vector<32x128xf32>
    %c0_7 = arith.constant 0 : index
    %c0_8 = arith.constant 0 : index
    %5 = vector.load %arg5[%c0_7, %c0_8] : memref<32x256xf32, #tpu.memory_space<vmem>>, vector<32x256xf32>
    %c0_9 = arith.constant 0 : index
    %c0_10 = arith.constant 0 : index
    %6 = vector.load %arg7[%c0_9, %c0_10] : memref<128x128xf32, #tpu.memory_space<vmem>>, vector<128x128xf32>
    %c0_11 = arith.constant 0 : index
    %c0_12 = arith.constant 0 : index
    %7 = vector.load %arg4[%c0_11, %c0_12] : memref<1x128xf32, #tpu.memory_space<vmem>>, vector<1x128xf32>
    %c0_13 = arith.constant 0 : index
    %c0_14 = arith.constant 0 : index
    %8 = vector.load %arg6[%c0_13, %c0_14] : memref<1x256xf32, #tpu.memory_space<vmem>>, vector<1x256xf32>
    %c0_15 = arith.constant 0 : index
    %c0_16 = arith.constant 0 : index
    %9 = vector.load %arg8[%c0_15, %c0_16] : memref<1x128xf32, #tpu.memory_space<vmem>>, vector<1x128xf32>
    %cst = arith.constant dense<0.000000e+00> : vector<8x128xf32>
    %10 = tpu.matmul %1, %4, %cst {dimension_numbers = #tpu.dot_dimension_numbers<[1], [0], [0], [1], [0, 0, 1, 1], [], []>} : vector<8x32xf32>, vector<32x128xf32>, vector<8x128xf32> -> vector<8x128xf32>
    %11 = vector.broadcast %7 : vector<1x128xf32> to vector<8x128xf32>
    %12 = arith.addf %10, %11 : vector<8x128xf32>
    %cst_17 = arith.constant dense<0.000000e+00> : vector<8x256xf32>
    %13 = tpu.matmul %3, %5, %cst_17 {dimension_numbers = #tpu.dot_dimension_numbers<[1], [0], [0], [1], [0, 0, 1, 1], [], []>} : vector<8x32xf32>, vector<32x256xf32>, vector<8x256xf32> -> vector<8x256xf32>
    %14 = vector.broadcast %8 : vector<1x256xf32> to vector<8x256xf32>
    %15 = arith.addf %13, %14 : vector<8x256xf32>
    %16 = vector.extract_strided_slice %15 {offsets = [0, 0], sizes = [8, 128], strides = [1, 1]} : vector<8x256xf32> to vector<8x128xf32>
    %17 = vector.extract_strided_slice %15 {offsets = [0, 128], sizes = [8, 128], strides = [1, 1]} : vector<8x256xf32> to vector<8x128xf32>
    %18 = vector.extract_strided_slice %12 {offsets = [0, 0], sizes = [8, 32], strides = [1, 1]} : vector<8x128xf32> to vector<8x32xf32>
    %19 = vector.extract_strided_slice %16 {offsets = [0, 0], sizes = [8, 32], strides = [1, 1]} : vector<8x128xf32> to vector<8x32xf32>
    %20 = vector.extract_strided_slice %17 {offsets = [0, 0], sizes = [8, 32], strides = [1, 1]} : vector<8x128xf32> to vector<8x32xf32>
    %cst_18 = arith.constant dense<0.000000e+00> : vector<8x8xf32>
    %21 = tpu.matmul %18, %19, %cst_18 {dimension_numbers = #tpu.dot_dimension_numbers<[1], [1], [0], [0], [0, 0, 1, 0], [], []>} : vector<8x32xf32>, vector<8x32xf32>, vector<8x8xf32> -> vector<8x8xf32>
    %cst_19 = arith.constant dense<0xFF800000> : vector<8xf32>
    %22 = vector.multi_reduction <maximumf>, %21, %cst_19 [1] : vector<8x8xf32> to vector<8xf32>
    %23 = vector.shape_cast %22 : vector<8xf32> to vector<8x1xf32>
    %24 = vector.broadcast %23 : vector<8x1xf32> to vector<8x8xf32>
    %25 = arith.subf %21, %24 : vector<8x8xf32>
    %26 = math.exp %25 : vector<8x8xf32>
    %cst_20 = arith.constant dense<0.000000e+00> : vector<8xf32>
    %27 = vector.multi_reduction <add>, %26, %cst_20 [1] : vector<8x8xf32> to vector<8xf32>
    %28 = vector.shape_cast %27 : vector<8xf32> to vector<8x1xf32>
    %29 = vector.broadcast %28 : vector<8x1xf32> to vector<8x8xf32>
    %30 = arith.divf %26, %29 : vector<8x8xf32>
    %cst_21 = arith.constant dense<0.000000e+00> : vector<8x32xf32>
    %31 = tpu.matmul %30, %20, %cst_21 {dimension_numbers = #tpu.dot_dimension_numbers<[1], [0], [0], [1], [0, 0, 1, 1], [], []>} : vector<8x8xf32>, vector<8x32xf32>, vector<8x32xf32> -> vector<8x32xf32>
    %32 = vector.extract_strided_slice %12 {offsets = [0, 32], sizes = [8, 32], strides = [1, 1]} : vector<8x128xf32> to vector<8x32xf32>
    %33 = vector.extract_strided_slice %16 {offsets = [0, 32], sizes = [8, 32], strides = [1, 1]} : vector<8x128xf32> to vector<8x32xf32>
    %34 = vector.extract_strided_slice %17 {offsets = [0, 32], sizes = [8, 32], strides = [1, 1]} : vector<8x128xf32> to vector<8x32xf32>
    %cst_22 = arith.constant dense<0.000000e+00> : vector<8x8xf32>
    %35 = tpu.matmul %32, %33, %cst_22 {dimension_numbers = #tpu.dot_dimension_numbers<[1], [1], [0], [0], [0, 0, 1, 0], [], []>} : vector<8x32xf32>, vector<8x32xf32>, vector<8x8xf32> -> vector<8x8xf32>
    %cst_23 = arith.constant dense<0xFF800000> : vector<8xf32>
    %36 = vector.multi_reduction <maximumf>, %35, %cst_23 [1] : vector<8x8xf32> to vector<8xf32>
    %37 = vector.shape_cast %36 : vector<8xf32> to vector<8x1xf32>
    %38 = vector.broadcast %37 : vector<8x1xf32> to vector<8x8xf32>
    %39 = arith.subf %35, %38 : vector<8x8xf32>
    %40 = math.exp %39 : vector<8x8xf32>
    %cst_24 = arith.constant dense<0.000000e+00> : vector<8xf32>
    %41 = vector.multi_reduction <add>, %40, %cst_24 [1] : vector<8x8xf32> to vector<8xf32>
    %42 = vector.shape_cast %41 : vector<8xf32> to vector<8x1xf32>
    %43 = vector.broadcast %42 : vector<8x1xf32> to vector<8x8xf32>
    %44 = arith.divf %40, %43 : vector<8x8xf32>
    %cst_25 = arith.constant dense<0.000000e+00> : vector<8x32xf32>
    %45 = tpu.matmul %44, %34, %cst_25 {dimension_numbers = #tpu.dot_dimension_numbers<[1], [0], [0], [1], [0, 0, 1, 1], [], []>} : vector<8x8xf32>, vector<8x32xf32>, vector<8x32xf32> -> vector<8x32xf32>
    %46 = vector.extract_strided_slice %12 {offsets = [0, 64], sizes = [8, 32], strides = [1, 1]} : vector<8x128xf32> to vector<8x32xf32>
    %47 = vector.extract_strided_slice %16 {offsets = [0, 64], sizes = [8, 32], strides = [1, 1]} : vector<8x128xf32> to vector<8x32xf32>
    %48 = vector.extract_strided_slice %17 {offsets = [0, 64], sizes = [8, 32], strides = [1, 1]} : vector<8x128xf32> to vector<8x32xf32>
    %cst_26 = arith.constant dense<0.000000e+00> : vector<8x8xf32>
    %49 = tpu.matmul %46, %47, %cst_26 {dimension_numbers = #tpu.dot_dimension_numbers<[1], [1], [0], [0], [0, 0, 1, 0], [], []>} : vector<8x32xf32>, vector<8x32xf32>, vector<8x8xf32> -> vector<8x8xf32>
    %cst_27 = arith.constant dense<0xFF800000> : vector<8xf32>
    %50 = vector.multi_reduction <maximumf>, %49, %cst_27 [1] : vector<8x8xf32> to vector<8xf32>
    %51 = vector.shape_cast %50 : vector<8xf32> to vector<8x1xf32>
    %52 = vector.broadcast %51 : vector<8x1xf32> to vector<8x8xf32>
    %53 = arith.subf %49, %52 : vector<8x8xf32>
    %54 = math.exp %53 : vector<8x8xf32>
    %cst_28 = arith.constant dense<0.000000e+00> : vector<8xf32>
    %55 = vector.multi_reduction <add>, %54, %cst_28 [1] : vector<8x8xf32> to vector<8xf32>
    %56 = vector.shape_cast %55 : vector<8xf32> to vector<8x1xf32>
    %57 = vector.broadcast %56 : vector<8x1xf32> to vector<8x8xf32>
    %58 = arith.divf %54, %57 : vector<8x8xf32>
    %cst_29 = arith.constant dense<0.000000e+00> : vector<8x32xf32>
    %59 = tpu.matmul %58, %48, %cst_29 {dimension_numbers = #tpu.dot_dimension_numbers<[1], [0], [0], [1], [0, 0, 1, 1], [], []>} : vector<8x8xf32>, vector<8x32xf32>, vector<8x32xf32> -> vector<8x32xf32>
    %60 = vector.extract_strided_slice %12 {offsets = [0, 96], sizes = [8, 32], strides = [1, 1]} : vector<8x128xf32> to vector<8x32xf32>
    %61 = vector.extract_strided_slice %16 {offsets = [0, 96], sizes = [8, 32], strides = [1, 1]} : vector<8x128xf32> to vector<8x32xf32>
    %62 = vector.extract_strided_slice %17 {offsets = [0, 96], sizes = [8, 32], strides = [1, 1]} : vector<8x128xf32> to vector<8x32xf32>
    %cst_30 = arith.constant dense<0.000000e+00> : vector<8x8xf32>
    %63 = tpu.matmul %60, %61, %cst_30 {dimension_numbers = #tpu.dot_dimension_numbers<[1], [1], [0], [0], [0, 0, 1, 0], [], []>} : vector<8x32xf32>, vector<8x32xf32>, vector<8x8xf32> -> vector<8x8xf32>
    %cst_31 = arith.constant dense<0xFF800000> : vector<8xf32>
    %64 = vector.multi_reduction <maximumf>, %63, %cst_31 [1] : vector<8x8xf32> to vector<8xf32>
    %65 = vector.shape_cast %64 : vector<8xf32> to vector<8x1xf32>
    %66 = vector.broadcast %65 : vector<8x1xf32> to vector<8x8xf32>
    %67 = arith.subf %63, %66 : vector<8x8xf32>
    %68 = math.exp %67 : vector<8x8xf32>
    %cst_32 = arith.constant dense<0.000000e+00> : vector<8xf32>
    %69 = vector.multi_reduction <add>, %68, %cst_32 [1] : vector<8x8xf32> to vector<8xf32>
    %70 = vector.shape_cast %69 : vector<8xf32> to vector<8x1xf32>
    %71 = vector.broadcast %70 : vector<8x1xf32> to vector<8x8xf32>
    %72 = arith.divf %68, %71 : vector<8x8xf32>
    %cst_33 = arith.constant dense<0.000000e+00> : vector<8x32xf32>
    %73 = tpu.matmul %72, %62, %cst_33 {dimension_numbers = #tpu.dot_dimension_numbers<[1], [0], [0], [1], [0, 0, 1, 1], [], []>} : vector<8x8xf32>, vector<8x32xf32>, vector<8x32xf32> -> vector<8x32xf32>
    %74 = tpu.concatenate %31, %45, %59, %73 in 1 : vector<8x32xf32>, vector<8x32xf32>, vector<8x32xf32>, vector<8x32xf32> -> vector<8x128xf32>
    %75 = arith.addf %12, %74 : vector<8x128xf32>
    %cst_34 = arith.constant dense<0.000000e+00> : vector<8x128xf32>
    %76 = tpu.matmul %75, %6, %cst_34 {dimension_numbers = #tpu.dot_dimension_numbers<[1], [0], [0], [1], [0, 0, 1, 1], [], []>} : vector<8x128xf32>, vector<128x128xf32>, vector<8x128xf32> -> vector<8x128xf32>
    %77 = vector.broadcast %9 : vector<1x128xf32> to vector<8x128xf32>
    %78 = arith.addf %76, %77 : vector<8x128xf32>
    %cst_35 = arith.constant 0.000000e+00 : f32
    %79 = vector.broadcast %cst_35 : f32 to vector<8x128xf32>
    %80 = arith.subf %79, %78 : vector<8x128xf32>
    %81 = math.exp %80 : vector<8x128xf32>
    %cst_36 = arith.constant 1.000000e+00 : f32
    %82 = vector.broadcast %cst_36 : f32 to vector<8x128xf32>
    %83 = arith.addf %82, %81 : vector<8x128xf32>
    %cst_37 = arith.constant 1.000000e+00 : f32
    %84 = vector.broadcast %cst_37 : f32 to vector<8x128xf32>
    %85 = arith.divf %84, %83 : vector<8x128xf32>
    %86 = arith.mulf %78, %85 : vector<8x128xf32>
    %87 = arith.addf %75, %86 : vector<8x128xf32>
    %c0_38 = arith.constant 0 : index
    %c0_39 = arith.constant 0 : index
    %c0_40 = arith.constant 0 : index
    %88 = vector.load %arg9[%c0_38, %c0_39, %c0_40] : memref<1x8x128xf32, #tpu.memory_space<vmem>>, vector<1x8x128xf32>
    %89 = vector.shape_cast %88 : vector<1x8x128xf32> to vector<8x128xf32>
    %90 = vector.shape_cast %87 : vector<8x128xf32> to vector<1x8x128xf32>
    tpu.vector_store %arg9[%c0_38, %c0_39, %c0_40], %90 {strides = array<i32>} : memref<1x8x128xf32, #tpu.memory_space<vmem>>, vector<1x8x128xf32>,
    return
  }
  func.func @transform_0(%arg0: i32) -> (i32, i32, i32) {
    %c0_i32 = arith.constant 0 : i32
    %c0_i32_0 = arith.constant 0 : i32
    %c0_i32_1 = arith.constant 0 : i32
    return %arg0, %c0_i32, %c0_i32_0 : i32, i32, i32
  }
  func.func @transform_1(%arg0: i32) -> (i32, i32, i32) {
    %c0_i32 = arith.constant 0 : i32
    %c0_i32_0 = arith.constant 0 : i32
    %c0_i32_1 = arith.constant 0 : i32
    return %arg0, %c0_i32, %c0_i32_0 : i32, i32, i32
  }
  func.func @transform_2(%arg0: i32) -> (i32, i32) {
    %c0_i32 = arith.constant 0 : i32
    %c0_i32_0 = arith.constant 0 : i32
    %c0_i32_1 = arith.constant 0 : i32
    return %c0_i32, %c0_i32_0 : i32, i32
  }
  func.func @transform_3(%arg0: i32) -> (i32, i32) {
    %c0_i32 = arith.constant 0 : i32
    %c0_i32_0 = arith.constant 0 : i32
    %c0_i32_1 = arith.constant 0 : i32
    return %c0_i32, %c0_i32_0 : i32, i32
  }
  func.func @transform_4(%arg0: i32) -> (i32, i32) {
    %c0_i32 = arith.constant 0 : i32
    %c0_i32_0 = arith.constant 0 : i32
    %c0_i32_1 = arith.constant 0 : i32
    return %c0_i32, %c0_i32_0 : i32, i32
  }
  func.func @transform_5(%arg0: i32) -> (i32, i32) {
    %c0_i32 = arith.constant 0 : i32
    %c0_i32_0 = arith.constant 0 : i32
    %c0_i32_1 = arith.constant 0 : i32
    return %c0_i32, %c0_i32_0 : i32, i32
  }
  func.func @transform_6(%arg0: i32) -> (i32, i32) {
    %c0_i32 = arith.constant 0 : i32
    %c0_i32_0 = arith.constant 0 : i32
    %c0_i32_1 = arith.constant 0 : i32
    return %c0_i32, %c0_i32_0 : i32, i32
  }
  func.func @transform_7(%arg0: i32) -> (i32, i32) {
    %c0_i32 = arith.constant 0 : i32
    %c0_i32_0 = arith.constant 0 : i32
    %c0_i32_1 = arith.constant 0 : i32
    return %c0_i32, %c0_i32_0 : i32, i32
  }
  func.func @transform_8(%arg0: i32) -> (i32, i32, i32) {
    %c0_i32 = arith.constant 0 : i32
    %c0_i32_0 = arith.constant 0 : i32
    %c0_i32_1 = arith.constant 0 : i32
    return %arg0, %c0_i32, %c0_i32_0 : i32, i32, i32
  }
}

</mosaic_0001>

<bundles_post_ra>
// kernel: tpu_custom_call.1
= control target key start
LH: loop header
LB: loop body
LE: loop exit
PB: predicated region body
PF: predicated region fallthrough
CT: control target
= control target key end

     0   :  { %s2489_s0 = inlined_call_operand.hbm [shape: f32[2,8,32], index: 0, kind: input, shape index: {}]   ;;  %s2490_s1 = inlined_call_operand.hbm [shape: f32[2,8,32], index: 1, kind: input, shape index: {}]   ;;  %s2491_s2 = inlined_call_operand.hbm [shape: f32[32,128], index: 2, kind: input, shape index: {}]   ;;  %s2492_s3 = inlined_call_operand.vmem [shape: f32[1,128], index: 3, kind: input, shape index: {}]   ;;  %s2493_s4 = inlined_call_operand.hbm [shape: f32[32,256], index: 4, kind: input, shape index: {}]   ;;  %s2494_s5 = inlined_call_operand.vmem [shape: f32[1,256], index: 5, kind: input, shape index: {}]   ;;  %s2495_s6 = inlined_call_operand.hbm [shape: f32[128,128], index: 6, kind: input, shape index: {}]   ;;  %s2496_s7 = inlined_call_operand.vmem [shape: f32[1,128], index: 7, kind: input, shape index: {}]   ;;  %s2497_s8 = inlined_call_operand.hbm [shape: f32[2,8,128], index: 8, kind: output, shape index: {}]  }
   0x1   :  { %2506 = sst [smem:[#allocation19_spill]] %s2491_s2 }
   0x2   :  { %2507 = sst [smem:[#allocation20_spill]] %s2493_s4 }
   0x3   :  { %2508 = sst [smem:[#allocation21_spill]] %s2495_s6 }
   0x4   :  { %13 = vsyncpa [#allocation3], 0 }
   0x5   :  { %15 = vsyncpa [#allocation3 + $0x1], 0 }
   0x6   :  { %16 = vsyncpa [#allocation6], 0 }
   0x7   :  { %18 = vsyncpa [#allocation6 + $0x1], 0 }
   0x8   :  { %19 = vsyncpa [#allocation9], 0 }
   0x9   :  { %20 = vsyncpa [#allocation4], 0 }
   0xa   :  { %22 = vsyncpa [#allocation4 + $0x1], 0  ;;  %s2090_s27 = smov 0   ;;  %s2092_s28 = smov 0  }
   0xb   :  { %s2094_s29 = smov 0   ;;  %s2096_s30 = smov 0  }
   0xc LB: > { %2509 = sst [smem:[#allocation17_spill]] %s2015_s27  ;;  %s2111_s9 = sadd.s32 4294967295, %s2027_s30   ;;  %s2027_s30 = sphi %s2096_s30, %s2538_s30   ;;  %s2023_s29 = sphi %s2094_s29, %s2537_s29   ;;  %s2019_s28 = sphi %s2092_s28, %s2536_s28   ;;  %s2015_s27 = sphi %s2090_s27, %s2535_s27  }
   0xd   : > { %s1494_s10 = sadd.s32 4294967294, %s2027_s30   ;;  %p48_p0 = scmp.ne.s32.totalorder %s2019_s28, %s2015_s27 }
   0xe   : > { %p2498_p1 = scmp.eq.s32.totalorder %s2111_s9, 0  ;;  %p230_p3 = scmp.eq.s32.totalorder %s1494_s10, 1 }
   0xf   : > { %p1495_p5 = scmp.ge.s32.totalorder %s2027_s30, 1  ;;  %p237_p7 = scmp.lt.s32.totalorder %s2027_s30, 3 }
  0x10   : > { %p2120_p4 = por %p2498_p1, %p48_p0  ;;  %p2125_p6 = por %p230_p3, %p48_p0 }
  0x11   : > { %p2130_p8 = pnand %p1495_p5, %p237_p7  ;;  %s2029_s14 = smov [#allocation7]  }
  0x12   : > { %s2510_s11 = scalar_select %p2120_p4, 1, 0 }
  0x13   : > { %s2511_s12 = scalar_select %p2125_p6, 1, 0 }
  0x14   : > { %s2513_s13 = scalar_select %p2130_p8, 1, 0 }
  0x15   : > { %2512 = sst [smem:[#allocation18_spill]] %s2511_s12  ;;  %s249_s15 = sshll.u32 %s2029_s14, 4  ;;  %s2134_s15 = int_to_ptr.vmem [resolvable:$true] %s249_s15 }
  0x16   : > { %p1711_p9 = pneg %p2130_p8  ;;  %s2030_s17 = smov [#allocation8]  }
  0x17   : > { %s265_s18 = sshll.u32 %s2030_s17, 4  ;;  %s2515_s2 = sld [smem:[#allocation19_spill]]  ;;  %s2145_s18 = int_to_ptr.vmem [resolvable:$true] %s265_s18 }
  0x18   : > { %p2141_p11 = pnand %p1711_p9, %p2498_p1 }
  0x1a   : > { %p2155_p13 = pneg %p2141_p11 }
  0x1d   : > { %s1805_s21 = scalar_lea.hbm %s2515_s2, 512 }
  0x1e   : > { %p1806_p12 = scmp.ne.s32.totalorder %s2515_s2, %s1805_s21  ;;  %p1812_p5 = scmp.lt.u32.totalorder %s1805_s21, %s2515_s2 }
  0x20   : > { %p1808_p0 = pnand %p2155_p13, %p1806_p12 }
  0x22   : > { %p1809_p3 = pneg %p1808_p0 }
  0x24   : > { %p1814_p7 = pnand %p1812_p5, %p1809_p3 }
  0x26   : > { %1817 = shalt.err (!%p1814_p7)
}
  0x27   : > { %s1818_s10 = scalar_lea.vmem %s2134_s15, 512  ;;  %p1826_p2 = scmp.lt.s32.totalorder %s2134_s15, %s2134_s15 }
  0x28   : > { %p1819_p9 = scmp.ne.s32.totalorder %s2134_s15, %s1818_s10  ;;  %p1827_p6 = scmp.lt.s32.totalorder %s1818_s10, %s1818_s10 }
  0x2a   : > { %p1821_p10 = pnand %p1819_p9, %p2155_p13  ;;  %p1828_p12 = por %p1827_p6, %p1826_p2 }
  0x2c   : > { %p1822_p1 = pneg %p1821_p10 }
  0x2e   : > { %p1829_p0 = pnand %p1828_p12, %p1822_p1 }
  0x30   : > { %1832 = shalt.err (!%p1829_p0)
}
  0x31   : > { %s2500_s14 = smov 128   ;;  %s2501_s17 = smov 8  }
  0x32   : > { %1714 = dma.hbm_to_vmem [thread:$0]  (!%p2141_p11), %s2515_s2, 512, %s2134_s15, [#allocation6], %s2500_s14, %s2500_s14, %s2501_s17  }
  0x33   : > { %s2517_s4 = sld [smem:[#allocation20_spill]] }
  0x39   : > { %s1833_s23 = scalar_lea.hbm %s2517_s4, 1024 }
  0x3a   : > { %p1834_p1 = scmp.ne.s32.totalorder %s2517_s4, %s1833_s23  ;;  %p1840_p10 = scmp.lt.u32.totalorder %s1833_s23, %s2517_s4 }
  0x3c   : > { %p1836_p2 = pnand %p1834_p1, %p2155_p13 }
  0x3e   : > { %p1837_p6 = pneg %p1836_p2 }
  0x40   : > { %p1842_p3 = pnand %p1840_p10, %p1837_p6 }
  0x42   : > { %1845 = shalt.err (!%p1842_p3)
}
  0x43   : > { %s1846_s15 = scalar_lea.vmem %s2145_s18, 1024  ;;  %p1854_p12 = scmp.lt.s32.totalorder %s2145_s18, %s2145_s18 }
  0x44   : > { %p1847_p5 = scmp.ne.s32.totalorder %s2145_s18, %s1846_s15  ;;  %p1855_p0 = scmp.lt.s32.totalorder %s1846_s15, %s1846_s15 }
  0x46   : > { %p1849_p7 = pnand %p1847_p5, %p2155_p13  ;;  %p1856_p1 = por %p1855_p0, %p1854_p12 }
  0x48   : > { %p1850_p9 = pneg %p1849_p7 }
  0x4a   : > { %p1857_p2 = pnand %p1856_p1, %p1850_p9 }
  0x4c   : > { %1860 = shalt.err (!%p1857_p2)
}
  0x4d   : > { %s2033_s19 = smov 256   ;;  %s2034_s12 = smov 16  }
  0x4e   : > { %1717 = dma.hbm_to_vmem [thread:$0]  (!%p2141_p11), %s2517_s4, 1024, %s2145_s18, [#allocation9], %s2033_s19, %s2033_s19, %s2034_s12  }
  0x4f   : > { %s2035_s22 = smov [#allocation10]   ;;  %s2203_s25 = sadd.s32 1, %s2027_s30  }
  0x50   : > { %s281_s23 = sshll.u32 %s2035_s22, 4  ;;  %s2518_s6 = sld [smem:[#allocation21_spill]]  ;;  %s282_s23 = int_to_ptr.vmem [resolvable:$true] %s281_s23 }
  0x56   : > { %s1861_s15 = scalar_lea.hbm %s2518_s6, 2048 }
  0x57   : > { %p1862_p6 = scmp.ne.s32.totalorder %s2518_s6, %s1861_s15  ;;  %p1868_p5 = scmp.lt.u32.totalorder %s1861_s15, %s2518_s6 }
  0x59   : > { %p1864_p10 = pnand %p1862_p6, %p2155_p13 }
  0x5b   : > { %p1865_p3 = pneg %p1864_p10 }
  0x5d   : > { %p1870_p7 = pnand %p1868_p5, %p1865_p3 }
  0x5f   : > { %1873 = shalt.err (!%p1870_p7)
}
  0x60   : > { %s1874_s18 = scalar_lea.vmem %s282_s23, 2048  ;;  %p1882_p1 = scmp.lt.s32.totalorder %s282_s23, %s282_s23 }
  0x61   : > { %p1875_p9 = scmp.ne.s32.totalorder %s282_s23, %s1874_s18  ;;  %p1883_p2 = scmp.lt.s32.totalorder %s1874_s18, %s1874_s18 }
  0x63   : > { %p1877_p12 = pnand %p1875_p9, %p2155_p13  ;;  %p1884_p4 = por %p1883_p2, %p1882_p1 }
  0x65   : > { %p1878_p0 = pneg %p1877_p12 }
  0x67   : > { %p1885_p8 = pnand %p1884_p4, %p1878_p0 }
  0x69   : > { %1888 = shalt.err (!%p1885_p8)
}
  0x6a   : > { %s2519_s14 = smov 8   ;;  %s2520_s17 = smov 128  }
  0x6b   : > { %1720 = dma.hbm_to_vmem [thread:$0]  (!%p2141_p11), %s2518_s6, 2048, %s282_s23, [#allocation9], %s2520_s17, %s2520_s17, %s2519_s14  }
  0x6c   : > { %s32_s24 = ssub.s32 %s2027_s30, %s2203_s25  ;;  %s35_s16 = sadd.s32 1, %s2023_s29 }
  0x6d   : > { %p33_p4 = scmp.eq.s32.totalorder %s32_s24, 0  ;;  %p42_p8 = scmp.ne.s32.totalorder %s2023_s29, %s2019_s28 }
  0x6e   : > { %p43_p13 = scmp.eq.s32.totalorder %s2027_s30, 0  ;;  %p1735_p6 = scmp.lt.s32.totalorder %s2027_s30, 2 }
  0x6f   : > { %s2234_s19 = scalar_select %p33_p4, %s2023_s29, %s35_s16  }
  0x70   : > { %p44_p10 = por %p43_p13, %p42_p8  ;;  %p2521_p3 = scmp.eq.s32.totalorder %s2111_s9, 1 }
  0x71   : > { %s298_s20 = sand.u32 1, %s2023_s29   ;;  %s1501_s21 = sshll.u32 %s2027_s30, 7 }
  0x72   : > { %p2238_p5 = por %p2521_p3, %p42_p8  ;;  %s2244_s22 = sshll.u32 %s298_s20, 3 }
  0x73   : > { %s2249_s10 = scalar_lea.hbm %s2489_s0, %s1501_s21  ;;  %s302_s15 = scalar_lea.vmem [#allocation2], %s2244_s22 }
  0x74   : > { %s2522_s12 = scalar_select %p2238_p5, 1, 0 }
  0x75   : > { %s309_s18 = sshll.u32 %s302_s15, 4  ;;  %p2252_p11 = pnand %p1735_p6, %p44_p10  ;;  %s2256_s18 = int_to_ptr.vmem [resolvable:$true] %s309_s18 }
  0x76   : > { %s2261_s27 = scalar_lea.hbm %s2490_s1, %s1501_s21  ;;  %s299_s24 = scalar_lea.sflag [#allocation3], %s298_s20 }
  0x77   : > { %s1889_s16 = scalar_lea.hbm %s2249_s10, 128  ;;  %p1891_p9 = pneg %p2252_p11 }
  0x78   : > { %p1890_p7 = scmp.ne.s32.totalorder %s2249_s10, %s1889_s16  ;;  %s1894_s15 = scalar_lea.hbm %s2489_s0, 256 }
  0x79   : > { %p1895_p1 = scmp.lt.u32.totalorder %s2249_s10, %s2489_s0  ;;  %p1896_p2 = scmp.lt.u32.totalorder %s1894_s15, %s1889_s16 }
  0x7a   : > { %p1892_p12 = pnand %p1891_p9, %p1890_p7  ;;  %p1898_p8 = scmp.lt.u32.totalorder %s1889_s16, %s2249_s10 }
  0x7b   : > { %p1897_p4 = por %p1896_p2, %p1895_p1 }
  0x7c   : > { %p1893_p0 = pneg %p1892_p12 }
  0x7d   : > { %p1899_p13 = por %p1898_p8, %p1897_p4 }
  0x7f   : > { %p1900_p6 = pnand %p1899_p13, %p1893_p0 }
  0x81   : > { %1903 = shalt.err (!%p1900_p6)
}
  0x82   : > { %s1904_s20 = scalar_lea.vmem %s2256_s18, 128  ;;  %s2036_s21 = smov [#allocation2]  }
  0x83   : > { %p1905_p10 = scmp.ne.s32.totalorder %s2256_s18, %s1904_s20  ;;  %s1909_s17 = sshll.u32 %s2036_s21, 4  ;;  %s1910_s17 = int_to_ptr.vmem [resolvable:$false] %s1909_s17 }
  0x84   : > { %s1911_s4 = scalar_lea.vmem %s1910_s17, 256  ;;  %p1912_p12 = scmp.lt.s32.totalorder %s2256_s18, %s1910_s17 }
  0x85   : > { %p1907_p3 = pnand %p1905_p10, %p1891_p9  ;;  %p1913_p1 = scmp.lt.s32.totalorder %s1911_s4, %s1904_s20 }
  0x87   : > { %p1908_p7 = pneg %p1907_p3  ;;  %p1914_p2 = por %p1913_p1, %p1912_p12 }
  0x89   : > { %p1915_p4 = pnand %p1914_p2, %p1908_p7 }
  0x8b   : > { %1918 = shalt.err (!%p1915_p4)
}
  0x8c   : > { %1724 = dma.hbm_to_vmem [thread:$0]  (!%p2252_p11), %s2249_s10, 128, %s2256_s18, %s299_s24  }
  0x8d   : > { %s316_s6 = sand.u32 1, %s2027_s30   ;;  %s320_s2 = scalar_lea.vmem [#allocation5], %s2244_s22 }
  0x8e   : > { %s327_s16 = sshll.u32 %s320_s2, 4  ;;  %s317_s26 = scalar_lea.sflag [#allocation6], %s316_s6  ;;  %s328_s16 = int_to_ptr.vmem [resolvable:$true] %s327_s16 }
  0x8f   : > { %s1919_s23 = scalar_lea.hbm %s2261_s27, 128  ;;  %s1924_s21 = scalar_lea.hbm %s2490_s1, 256 }
  0x90   : > { %p1920_p0 = scmp.ne.s32.totalorder %s2261_s27, %s1919_s23  ;;  %p1925_p6 = scmp.lt.u32.totalorder %s2261_s27, %s2490_s1 }
  0x91   : > { %p1926_p10 = scmp.lt.u32.totalorder %s1924_s21, %s1919_s23  ;;  %p1928_p7 = scmp.lt.u32.totalorder %s1919_s23, %s2261_s27 }
  0x92   : > { %p1922_p8 = pnand %p1920_p0, %p1891_p9 }
  0x93   : > { %p1927_p3 = por %p1926_p10, %p1925_p6 }
  0x94   : > { %p1923_p13 = pneg %p1922_p8 }
  0x95   : > { %p1929_p12 = por %p1928_p7, %p1927_p3 }
  0x97   : > { %p1930_p1 = pnand %p1929_p12, %p1923_p13 }
  0x99   : > { %1933 = shalt.err (!%p1930_p1)
}
  0x9a   : > { %s1934_s22 = scalar_lea.vmem %s328_s16, 128  ;;  %s2037_s10 = smov [#allocation5]  }
  0x9b   : > { %p1935_p2 = scmp.ne.s32.totalorder %s328_s16, %s1934_s22  ;;  %s1939_s18 = sshll.u32 %s2037_s10, 4  ;;  %s1940_s18 = int_to_ptr.vmem [resolvable:$false] %s1939_s18 }
  0x9c   : > { %s1941_s24 = scalar_lea.vmem %s1940_s18, 256  ;;  %p1942_p8 = scmp.lt.s32.totalorder %s328_s16, %s1940_s18 }
  0x9d   : > { %p1937_p4 = pnand %p1935_p2, %p1891_p9  ;;  %p1943_p5 = scmp.lt.s32.totalorder %s1941_s24, %s1934_s22 }
  0x9f   : > { %p1938_p0 = pneg %p1937_p4  ;;  %p1944_p6 = por %p1943_p5, %p1942_p8 }
  0xa1   : > { %p1945_p10 = pnand %p1944_p6, %p1938_p0 }
  0xa3   : > { %1948 = shalt.err (!%p1945_p10)
}
  0xa4   : > { %1727 = dma.hbm_to_vmem [thread:$0]  (!%p2252_p11), %s2261_s27, 128, %s328_s16, %s317_s26  }
  0xa5   : > { %p2524_p13 = scmp.ne.s32.totalorder %s2513_s13, 0 }
  0xa6   : > { %s2312_s6 = sand.u32 (!%p2524_p13), 1, %s2019_s28   ;;  %p2525_p5 = scmp.ne.s32.totalorder (!%p2524_p13), %s2510_s11, 0 }
  0xa7   : > { %336 = sbr.rel (%p2524_p13) target bundleno = 2131 (0x853), region = 52  ;;  %s2315_s2 = sshll.u32 (!%p2524_p13), %s2312_s6, 3 }
  0xa8   : > { %s339_s23 = scalar_lea.sflag (!%p2524_p13), [#allocation3], %s2312_s6  ;;  %s342_s15 = scalar_lea.vmem (!%p2524_p13), [#allocation2], %s2315_s2 }
  0xae   : > { %1994 = dma.done.wait (%p2525_p5), %s339_s23, 128  }
  0xaf   : > { %1996 = vsyncadd (%p2525_p5), %s339_s23, 4294967168  ;;  %s347_s13 = sand.u32 1, %s2111_s9   ;;  %s351_s27 = scalar_lea.vmem [#allocation5], %s2315_s2 }
  0xb0   : > { %s348_s14 = scalar_lea.sflag [#allocation6], %s347_s13 }
  0xb1   : > { %1998 = dma.done.wait (%p2525_p5), %s348_s14, 128  }
  0xb2   : > { %2000 = vsyncadd (%p2525_p5), %s348_s14, 4294967168  ;;  %p2526_p11 = scmp.eq.s32.totalorder %s2111_s9, 0 }
  0xb4   : > { %2002 = dma.done.wait (%p2526_p11), [#allocation6], 512   ;;  %p2527_p9 = pmov %p2526_p11 }
  0xb6   : > { %2004 = vsyncadd (%p2527_p9), [#allocation6], 4294966784  ;;  %p2528_p3 = pmov %p2527_p9 }
  0xb8   : > { %2006 = dma.done.wait (%p2528_p3), [#allocation9], 3072   ;;  %p2529_p7 = pmov %p2528_p3 }
  0xb9   : > { %v2038_v0 = vmov 0.0|0.0   ;;  %vm2039_vm0 = vmmov 0   ;;  %v2040_v1 = vmov 0.0   ;;  %v403_v2 = vld [vmem:[#allocation7] sm:$0xff]  ;;  %v404_v3 = vld [vmem:[#allocation7 + $0x8] sm:$0xff]  ;;  %v405_v4 = vld [vmem:[#allocation7 + $0x10] sm:$0xff]  ;;  %v515_v22 = vlaneseq }
  0xba   : > { %2008 = vsyncadd (%p2529_p7), [#allocation9], 4294964224  ;;  %1655 = vmatprep.subr.bf16.mxu1 %v2038_v0  ;;  %1577 = vmatprep.mubr.msk.f32.mxu1 %vm2039_vm0, %v2040_v1  ;;  %v1656_v5 = vpack.c.bf16 %v404_v3, %v403_v2  ;;  %v406_v6 = vld [vmem:[#allocation7 + $0x18] sm:$0xff]  ;;  %v408_v7 = vld [vmem:[#allocation8 + $0x8] sm:$0xff]  ;;  %vm440_vm1 = vcmask 261120   ;;  %s2041_s21 = smov 96  }
  0xbb   : > { %1600 = vmatprep.subr.mxu0 %v2040_v1  ;;  %1602 = vmatprep.mubr.msk.f32.mxu0 %vm2039_vm0, %v2040_v1  ;;  %v410_v8 = vld [vmem:[#allocation8 + $0x18] sm:$0xff]  ;;  %v1659_v9 = vpack.c.bf16 %v406_v6, %v405_v4  ;;  %v407_v11 = vld [vmem:[#allocation8] sm:$0xff]  ;;  %v409_v12 = vld [vmem:[#allocation8 + $0x10] sm:$0xff]  ;;  %v516_v23 = vshrl.u32 %v515_v22, 7  ;;  %s2042_s17 = smov 64   ;;  %s2043_s4 = smov 32  }
  0xbc   : > { %1657 = vmatpush3.bf16.msra.mxu1 %v1656_v5  ;;  %v1661_v10 = vpack.c.bf16 %v410_v8, %v408_v7  ;;  %v412_v13 = vld [vmem:[#allocation8 + $0x28] sm:$0xff]  ;;  %v414_v14 = vld [vmem:[#allocation8 + $0x38] sm:$0xff]  ;;  %v1663_v16 = vpack.c.bf16 %v409_v12, %v407_v11  ;;  %v411_v18 = vld [vmem:[#allocation8 + $0x20] sm:$0xff]  ;;  %vm675_vm2 = vcmask 64512   ;;  %vm1269_vm3 = vcmask 523264   ;;  %s1528_s18 = sshll.u32 %s2111_s9, 7 }
  0xbd   : > { %1658 = vmatprep.subr.bf16.mxu1 %v2038_v0  ;;  %v401_v15 = vld [vmem:[%s342_s15] sm:$0xff]  ;;  %v1665_v17 = vpack.c.bf16 %v414_v14, %v412_v13  ;;  %v413_v19 = vld [vmem:[#allocation8 + $0x30] sm:$0xff]  ;;  %v517_v26 = vsub.s32 0, %v516_v23  ;;  %v521_v29 = vsub.s32 1, %v516_v23  ;;  %vm1271_vm4 = vcmask 785408   ;;  %s400_s24 = scalar_lea.vmem [#allocation11], %s2315_s2  ;;  %s2445_s14 = scalar_lea.hbm %s2497_s8, %s1528_s18 }
  0xbe   : > { %v1667_v20 = vpack.c.bf16 %v413_v19, %v411_v18  ;;  %v402_v21 = vld [vmem:[%s351_s27] sm:$0xff]  ;;  %v432_v27 = vld [vmem:[%s2494_s5] sm:$0x3]  ;;  %s1373_s23 = sshll.u32 %s400_s24, 4  ;;  %s1360_s27 = scalar_lea.sflag [#allocation4], %s2312_s6  ;;  %s2447_s23 = int_to_ptr.vmem [resolvable:$true] %s1373_s23 }
  0xbf   : > { %v518_v28 = vrot.slane %v432_v27, %v517_v26  ;;  %v1511_v31 = vld [vmem:[%s2492_s3] ss:$0 sm:$0xff]  ;;  %v522_v33 = vrot.slane %v432_v27, %v521_v29  ;;  %s1949_s11 = scalar_lea.vmem %s2447_s23, 128  ;;  %p2530_p1 = scmp.ne.s32.totalorder %s2522_s12, 0 }
  0xc0   : > { %1660 = vmatpush3.bf16.msra.mxu1 %v1659_v9  ;;  %p1950_p12 = scmp.ne.s32.totalorder %s2447_s23, %s1949_s11  ;;  %s2044_s9 = smov [#allocation11]  }
  0xc1   : > { %1662 = vmatprep.subr.bf16.mxu1 %v1661_v10  ;;  %s1953_s2 = sshll.u32 %s2044_s9, 4  ;;  %s1954_s2 = int_to_ptr.vmem [resolvable:$false] %s1953_s2 }
  0xc2   : > { %p1951_p2 = pnand %p1950_p12, %p2530_p1  ;;  %s1955_s16 = scalar_lea.vmem %s1954_s2, 256 }
  0xc3   : > { %1578 = vmatmul.mubr.msk.f32.vlgmr.msra.gmra.mrb[0].mxu1 %vm440_vm1, %v401_v15  ;;  %p1956_p0 = scmp.lt.s32.totalorder %s2447_s23, %s1954_s2  ;;  %p1957_p8 = scmp.lt.s32.totalorder %s1955_s16, %s1949_s11 }
  0xc4   : > { %1664 = vmatpush1.bf16.msra.mxu1 %v1663_v16  ;;  %592 = vmatprep.mubr.f32.mxu1 %v2040_v1  ;;  %p1952_p4 = pneg %p1951_p2 }
  0xc5   : > { %1666 = vmatprep.subr.bf16.mxu1 %v1665_v17  ;;  %p1958_p6 = por %p1957_p8, %p1956_p0 }
  0xc7   : > { %p1959_p10 = pnand %p1958_p6, %p1952_p4 }
  0xc8   : > { %1668 = vmatpush1.bf16.msra.mxu1 %v1667_v20 }
  0xc9   : > { %1580 = vmatprep.subr.mxu1 %v2040_v1 }
  0xcb   : > { %1513 = vmatmul.mubr.msk.f32.vlgmr.msra.gmra.mrb[2].mxu1 %vm440_vm1, %v402_v21 }
  0xcc   : > { %1582 = vmatprep.mubr.msk.f32.mxu1 %vm2039_vm0, %v2040_v1 }
 0x196   : > { %v510_v24 = vpop.f32.mrb[0].mxu1 }
 0x197   : > { %v1579_v25 = vpop.f32.mrb[1].mxu1  ;;  %v2362_v35 = vadd.f32 %v1511_v31, %v510_v24  ;;  %v416_v31 = vld [vmem:[#allocation10 + $0x8] sm:$0xff] }
 0x19e   : > { %v594_v30 = vpop.f32.mrb[2].mxu1 }
 0x19f   : > { %v595_v32 = vadd.f32 %v594_v30, %v518_v28  ;;  %v596_v34 = vpop.f32.mrb[3].mxu1  ;;  %v415_v30 = vld [vmem:[#allocation10] sm:$0xff] }
 0x1a0   : > { %v2365_v36 = vadd.f32 %v596_v34, %v522_v33  ;;  %v1670_v33 = vpack.c.bf16 %v416_v31, %v415_v30  ;;  %v418_v34 = vld [vmem:[#allocation10 + $0x18] sm:$0xff] }
 0x1a1   : > { %762 = vrot.lane.b32.xlu1 %v595_v32, %s2041_s21  ;;  %1581 = vmatpush3.xpose.msk.msra.mxu1 %vm440_vm1, %v595_v32 }
 0x1a2   : > { %1585 = vmatprep.subr.mxu1 %v2040_v1 }
 0x1a4   : > { %1583 = vmatmul.mubr.msk.f32.vlgmr.msra.gmra.mrb[4].mxu1 %vm440_vm1, %v2362_v35 }
 0x1a5   : > { %760 = vrot.lane.b32.xlu1 %v2362_v35, %s2041_s21  ;;  %1586 = vmatpush3.msra.mxu1 %v2365_v36 }
 0x1a6   : > { %1587 = vmatprep.mubr.msk.f32.mxu1 %vm2039_vm0, %v2040_v1  ;;  %1590 = vmatprep.subr.mxu1 %v2040_v1 }
 0x1a9   : > { %926 = vrot.lane.b32.xlu1 %v2362_v35, %s2042_s17 }
 0x1ad   : > { %1093 = vrot.lane.b32.xlu1 %v595_v32, %s2043_s4 }
 0x1b1   : > { %1091 = vrot.lane.b32.xlu1 %v2362_v35, %s2043_s4 }
 0x213   : > { %v763_v45 = vpop.permute.xlu1 %762 }
 0x217   : > { %v761_v46 = vpop.permute.xlu1 %760 }
 0x21b   : > { %v927_v47 = vpop.permute.xlu1 %926 }
 0x21f   : > { %v1094_v50 = vpop.permute.xlu1 %1093 }
 0x223   : > { %v1092_v52 = vpop.permute.xlu1 %1091 }
 0x277   : > { %v671_v37 = vpop.f32.mrb[4].mxu1 }
 0x278   : > { %v1584_v38 = vpop.f32.mrb[5].mxu1  ;;  %v676_v39 = vsel %vm675_vm2, %v671_v37, -inf }
 0x279   : > { %677 = vmax.xlane.f32.xlu0 %v676_v39  ;;  %v420_v38 = vld [vmem:[#allocation10 + $0x28] sm:$0xff] }
 0x306   : > { %v678_v40 = vpop.xlane.xlu0 %677 }
 0x307   : > { %v679_v41 = vsub.f32 %v671_v37, %v678_v40  ;;  %v419_v37 = vld [vmem:[#allocation10 + $0x20] sm:$0xff]  ;;  %v421_v40 = vld [vmem:[#allocation10 + $0x30] sm:$0xff] }
 0x308   : > { %v1676_v39 = vpack.c.bf16 %v420_v38, %v419_v37 }
 0x309   : > { %v680_v42 = vmul.f32 1.442695, %v679_v41 }
 0x30b   : > { %1785 = vpow2.f32 %v680_v42  ;;  %v423_v42 = vld [vmem:[#allocation10 + $0x40] sm:$0xff] }
 0x315   : > { %v1786_v43 = vpop.eup %1785 }
 0x316   : > { %v682_v44 = vsel %vm675_vm2, %v1786_v43, 0.0 }
 0x317   : > { %683 = vadd.xlane.f32.xlu0 %v682_v44 }
 0x32d   : > { %928 = vrot.lane.b32.xlu0 %v595_v32, %s2042_s17  ;;  %v417_v32 = vld [vmem:[#allocation10 + $0x10] sm:$0xff] }
 0x3a4   : > { %v684_v48 = vpop.xlane.xlu0 %683 }
 0x3a5   : > { %1787 = vrcp.f32 %v684_v48  ;;  %v427_v48 = vld [vmem:[#allocation10 + $0x60] sm:$0xff] }
 0x3a8   : > { %v929_v49 = vpop.permute.xlu0 %928 }
 0x3a9   : > { %1601 = vmatpush3.xpose.msk.msra.mxu0 %vm440_vm1, %v929_v49  ;;  %v428_v49 = vld [vmem:[#allocation10 + $0x68] sm:$0xff] }
 0x3aa   : > { %1610 = vmatprep.subr.mxu0 %v2040_v1 }
 0x3ac   : > { %1603 = vmatmul.mubr.msk.f32.vlgmr.msra.gmra.mrb[0].mxu0 %vm440_vm1, %v927_v47 }
 0x3ad   : > { %1611 = vmatpush3.xpose.msk.msra.mxu0 %vm440_vm1, %v1094_v50  ;;  %1612 = vmatprep.mubr.msk.f32.mxu0 %vm2039_vm0, %v2040_v1  ;;  %v1688_v50 = vpack.c.bf16 %v428_v49, %v427_v48 }
 0x3ae   : > { %1669 = vmatprep.subr.bf16.mxu0 %v2038_v0 }
 0x3af   : > { %v1788_v51 = vpop.eup %1787 }
 0x3b0   : > { %v686_v53 = vmul.f32 %v1788_v51, %v1786_v43  ;;  %1613 = vmatmul.mubr.msk.f32.vlgmr.msra.gmra.mrb[2].mxu0 %vm440_vm1, %v1092_v52  ;;  %v424_v43 = vld [vmem:[#allocation10 + $0x48] sm:$0xff]  ;;  %v429_v51 = vld [vmem:[#allocation10 + $0x70] sm:$0xff]  ;;  %v430_v52 = vld [vmem:[#allocation10 + $0x78] sm:$0xff] }
 0x3b1   : > { %1652 = vmatprep.mubr.msk.f32.mxu0 %vm2039_vm0, %v2040_v1  ;;  %1671 = vmatpush3.bf16.msra.mxu0 %v1670_v33  ;;  %v1682_v44 = vpack.c.bf16 %v424_v43, %v423_v42 }
 0x3b2   : > { %1588 = vmatmul.mubr.msk.f32.vlgmr.msra.gmra.mrb[6].mxu1 %vm675_vm2, %v686_v53  ;;  %1672 = vmatprep.subr.bf16.mxu0 %v2038_v0  ;;  %v1691_v53 = vpack.c.bf16 %v430_v52, %v429_v51 }
 0x3b3   : > { %1591 = vmatpush3.xpose.msk.msra.mxu1 %vm440_vm1, %v763_v45  ;;  %1592 = vmatprep.mubr.msk.f32.mxu1 %vm2039_vm0, %v2040_v1  ;;  %v425_v45 = vld [vmem:[#allocation10 + $0x50] sm:$0xff] }
 0x3b4   : > { %1595 = vmatprep.subr.mxu1 %v2040_v1 }
 0x3b6   : > { %1593 = vmatmul.mubr.msk.f32.vlgmr.msra.gmra.mrb[8].mxu1 %vm440_vm1, %v761_v46  ;;  %v426_v46 = vld [vmem:[#allocation10 + $0x58] sm:$0xff] }
 0x3b7   : > { %1597 = vmatprep.mubr.msk.f32.mxu1 %vm2039_vm0, %v2040_v1  ;;  %v1685_v47 = vpack.c.bf16 %v426_v46, %v425_v45 }
 0x47f   : > { %v1000_v54 = vpop.f32.mrb[0].mxu0 }
 0x480   : > { %v1604_v55 = vpop.f32.mrb[1].mxu0  ;;  %v1004_v56 = vsel %vm675_vm2, %v1000_v54, -inf }
 0x481   : > { %1005 = vmax.xlane.f32.xlu0 %v1004_v56 }
 0x483   : > { %v1165_v57 = vpop.f32.mrb[2].mxu0 }
 0x484   : > { %v1614_v58 = vpop.f32.mrb[3].mxu0  ;;  %v1169_v2 = vsel %vm675_vm2, %v1165_v57, -inf }
 0x485   : > { %v2402_v59 = vpop.f32.mrb[6].mxu1 }
 0x486   : > { %v1589_v60 = vpop.f32.mrb[7].mxu1 }
 0x489   : > { %v834_v61 = vpop.f32.mrb[8].mxu1 }
 0x48a   : > { %v1594_v62 = vpop.f32.mrb[9].mxu1  ;;  %v838_v63 = vsel %vm675_vm2, %v834_v61, -inf }
 0x48b   : > { %839 = vmax.xlane.f32.xlu1 %v838_v63 }
 0x48f   : > { %1170 = vmax.xlane.f32.xlu1 %v1169_v2 }
 0x50e   : > { %v1006_v3 = vpop.xlane.xlu0 %1005 }
 0x50f   : > { %v1007_v4 = vsub.f32 %v1000_v54, %v1006_v3 }
 0x511   : > { %v1008_v5 = vmul.f32 1.442695, %v1007_v4 }
 0x513   : > { %1789 = vpow2.f32 %v1008_v5  ;;  %v1526_v5 = vld [vmem:[%s2496_s7] ss:$0 sm:$0xff] }
 0x518   : > { %v840_v6 = vpop.xlane.xlu1 %839 }
 0x519   : > { %v841_v14 = vsub.f32 %v834_v61, %v840_v6 }
 0x51b   : > { %v842_v15 = vmul.f32 1.442695, %v841_v14 }
 0x51c   : > { %v1171_v7 = vpop.xlane.xlu1 %1170 }
 0x51d   : > { %v1790_v8 = vpop.eup %1789  ;;  %v1172_v9 = vsub.f32 %v1165_v57, %v1171_v7 }
 0x51e   : > { %v1010_v10 = vsel %vm675_vm2, %v1790_v8, 0.0 }
 0x51f   : > { %v1173_v11 = vmul.f32 1.442695, %v1172_v9  ;;  %1011 = vadd.xlane.f32.xlu0 %v1010_v10 }
 0x521   : > { %1791 = vpow2.f32 %v1173_v11 }
 0x522   : > { %1793 = vpow2.f32 %v842_v15 }
 0x52b   : > { %v1792_v12 = vpop.eup %1791 }
 0x52c   : > { %v1175_v13 = vsel %vm675_vm2, %v1792_v12, 0.0  ;;  %v1794_v16 = vpop.eup %1793 }
 0x52d   : > { %1176 = vadd.xlane.f32.xlu1 %v1175_v13  ;;  %v844_v17 = vsel %vm675_vm2, %v1794_v16, 0.0 }
 0x535   : > { %850 = vrot.lane.b32.xlu0 %v2365_v36, %s2041_s21 }
 0x53e   : > { %1015 = vrot.lane.b32.xlu1 %v2365_v36, %s2042_s17 }
 0x562   : > { %845 = vadd.xlane.f32.xlu1 %v844_v17 }
 0x573   : > { %1180 = vrot.lane.b32.xlu1 %v2365_v36, %s2043_s4  ;;  %v1673_v36 = vpack.c.bf16 %v418_v34, %v417_v32 }
 0x575   : > { %1674 = vmatpush3.bf16.msra.mxu0 %v1673_v36 }
 0x576   : > { %1675 = vmatprep.subr.bf16.mxu0 %v2038_v0 }
 0x579   : > { %1677 = vmatpush3.bf16.msra.mxu0 %v1676_v39 }
 0x57a   : > { %1678 = vmatprep.subr.bf16.mxu0 %v2038_v0 }
 0x5ac   : > { %v1012_v18 = vpop.xlane.xlu0 %1011 }
 0x5b0   : > { %v851_v19 = vpop.permute.xlu0 %850 }
 0x5b1   : > { %1596 = vmatpush3.msra.mxu1 %v851_v19 }
 0x5b2   : > { %1605 = vmatprep.subr.mxu1 %v2040_v1 }
 0x5ba   : > { %v1177_v20 = vpop.xlane.xlu1 %1176 }
 0x5be   : > { %v1016_v21 = vpop.permute.xlu1 %1015 }
 0x5ef   : > { %v846_v22 = vpop.xlane.xlu1 %845 }
 0x5f0   : > { %1795 = vrcp.f32 %v846_v22 }
 0x5f1   : > { %1797 = vrcp.f32 %v1012_v18 }
 0x5f2   : > { %1799 = vrcp.f32 %v1177_v20 }
 0x5f3   : > { %v1181_v28 = vpop.permute.xlu1 %1180 }
 0x5fa   : > { %v1796_v23 = vpop.eup %1795 }
 0x5fb   : > { %v848_v24 = vmul.f32 %v1796_v23, %v1794_v16  ;;  %v1798_v25 = vpop.eup %1797 }
 0x5fc   : > { %v1014_v26 = vmul.f32 %v1798_v25, %v1790_v8  ;;  %v1800_v27 = vpop.eup %1799 }
 0x5fd   : > { %1598 = vmatmul.mubr.msk.f32.vlgmr.msra.gmra.mrb[10].mxu1 %vm675_vm2, %v848_v24  ;;  %v1179_v29 = vmul.f32 %v1800_v27, %v1792_v12 }
 0x5fe   : > { %1606 = vmatpush3.msra.mxu1 %v1016_v21  ;;  %1607 = vmatprep.mubr.msk.f32.mxu1 %vm2039_vm0, %v2040_v1 }
 0x5ff   : > { %1615 = vmatprep.subr.mxu1 %v2040_v1 }
 0x601   : > { %1608 = vmatmul.mubr.msk.f32.vlgmr.msra.gmra.mrb[12].mxu1 %vm675_vm2, %v1014_v26 }
 0x602   : > { %1616 = vmatpush3.msra.mxu1 %v1181_v28  ;;  %1617 = vmatprep.mubr.msk.f32.mxu1 %vm2039_vm0, %v2040_v1  ;;  %v422_v1 = vld [vmem:[#allocation10 + $0x38] sm:$0xff] }
 0x603   : > { %v1679_v41 = vpack.c.bf16 %v422_v1, %v421_v40 }
 0x605   : > { %1618 = vmatmul.mubr.msk.f32.vlgmr.msra.gmra.mrb[14].mxu1 %vm675_vm2, %v1179_v29  ;;  %1680 = vmatpush3.bf16.msra.mxu0 %v1679_v41 }
 0x606   : > { %1681 = vmatprep.subr.bf16.mxu0 %v2038_v0 }
 0x609   : > { %1683 = vmatpush3.bf16.msra.mxu0 %v1682_v44 }
 0x60a   : > { %1684 = vmatprep.subr.bf16.mxu0 %v2038_v0 }
 0x60d   : > { %1686 = vmatpush3.bf16.msra.mxu0 %v1685_v47 }
 0x60e   : > { %1687 = vmatprep.subr.bf16.mxu0 %v2038_v0 }
 0x611   : > { %1689 = vmatpush3.bf16.msra.mxu0 %v1688_v50 }
 0x612   : > { %1690 = vmatprep.subr.bf16.mxu0 %v2038_v0 }
 0x615   : > { %1692 = vmatpush3.bf16.msra.mxu0 %v1691_v53 }
 0x6d0   : > { %v922_v54 = vpop.f32.mrb[10].mxu1 }
 0x6d1   : > { %1257 = vrot.lane.b32.xlu0 %v922_v54, %s2043_s4  ;;  %v1599_v55 = vpop.f32.mrb[11].mxu1 }
 0x6d4   : > { %v1087_v56 = vpop.f32.mrb[12].mxu1 }
 0x6d5   : > { %1261 = vrot.lane.b32.xlu1 %v1087_v56, %s2042_s17  ;;  %v1609_v57 = vpop.f32.mrb[13].mxu1 }
 0x6d8   : > { %v1252_v58 = vpop.f32.mrb[14].mxu1 }
 0x6d9   : > { %1265 = vrot.lane.b32.xlu0 %v1252_v58, %s2041_s21  ;;  %v1619_v60 = vpop.f32.mrb[15].mxu1 }
 0x743   : > { %v1258_v61 = vpop.permute.xlu0 %1257 }
 0x744   : > { %v1268_v0 = vsel %vm440_vm1, %v2402_v59, %v1258_v61 }
 0x747   : > { %v1262_v62 = vpop.permute.xlu1 %1261 }
 0x748   : > { %v1270_v63 = vsel %vm1269_vm3, %v1268_v0, %v1262_v62 }
 0x74b   : > { %v1266_v2 = vpop.permute.xlu0 %1265 }
 0x74c   : > { %v1272_v3 = vsel %vm1271_vm4, %v1270_v63, %v1266_v2 }
 0x74d   : > { %v1273_v4 = vadd.f32 %v1272_v3, %v2362_v35 }
 0x74f   : > { %1653 = vmatmul.mubr.f32.vlgmr.msra.gmra.mrb[4].mxu0 %v1273_v4 }
 0x822   : > { %v1346_v6 = vpop.f32.mrb[4].mxu0 }
 0x823   : > { %v1347_v7 = vadd.f32 %v1526_v5, %v1346_v6  ;;  %v1654_v8 = vpop.f32.mrb[5].mxu0 }
 0x825   : > { %v1350_v9 = vsub.f32 0.0, %v1347_v7 }
 0x827   : > { %v1351_v10 = vmul.f32 1.442695, %v1350_v9 }
 0x829   : > { %1801 = vpow2.f32 %v1351_v10 }
 0x833   : > { %v1802_v59 = vpop.eup %1801 }
 0x834   : > { %v1353_v11 = vadd.f32 1.0, %v1802_v59 }
 0x836   : > { %1803 = vrcp.f32 %v1353_v11 }
 0x840   : > { %v1804_v12 = vpop.eup %1803 }
 0x841   : > { %v1356_v35 = vmul.f32 %v1804_v12, %v1347_v7 }
 0x843   : > { %v1357_v13 = vadd.f32 %v1356_v35, %v1273_v4 }
 0x845   : > { %1358 = vst [vmem:[%s400_s24] sm:$0xff] %v1357_v13 }
 0x846   : > { %1962 = shalt.err (!%p1959_p10)
}
 0x847   : > { %s1963_s6 = scalar_lea.hbm %s2445_s14, 128  ;;  %s1967_s21 = scalar_lea.hbm %s2497_s8, 256 }
 0x848   : > { %p1964_p13 = scmp.ne.s32.totalorder %s2445_s14, %s1963_s6  ;;  %p1968_p9 = scmp.lt.u32.totalorder %s2445_s14, %s2497_s8 }
 0x849   : > { %p1969_p3 = scmp.lt.u32.totalorder %s1967_s21, %s1963_s6  ;;  %p1971_p12 = scmp.lt.u32.totalorder %s1963_s6, %s2445_s14 }
 0x84a   : > { %p1965_p5 = pnand %p1964_p13, %p2530_p1 }
 0x84b   : > { %p1970_p7 = por %p1969_p3, %p1968_p9 }
 0x84c   : > { %p1966_p11 = pneg %p1965_p5 }
 0x84d   : > { %p1972_p2 = por %p1971_p12, %p1970_p7 }
 0x84f   : > { %p1973_p4 = pnand %p1972_p2, %p1966_p11 }
 0x851   : > { %1976 = shalt.err (!%p1973_p4)
}
 0x852   : > { %1709 = dma.vmem_to_hbm [thread:$0]  (%p2530_p1), %s2447_s23, 128, %s2445_s14, %s1360_s27  }
 0x853 PF: > { %s2531_s22 = sld [smem:[#allocation17_spill]]  ;;  %s2532_s10 = sld [smem:[#allocation18_spill]] }
 0x854   : > { %p2534_p8 = scmp.ge.s32.totalorder %s2027_s30, 2 }
 0x859   : > { %s1385_s18 = sand.u32 1, %s2531_s22   ;;  %p2533_p0 = scmp.ne.s32.totalorder %s2532_s10, 0 }
 0x85a   : > { %s1386_s24 = scalar_lea.sflag [#allocation4], %s1385_s18 }
 0x85b   : > { %p1729_p6 = pnand %p2534_p8, %p2533_p0 }
 0x85d   : > { %2010 = dma.done.wait (!%p1729_p6), %s1386_s24, 128  }
 0x85e   : > { %2012 = vsyncadd (!%p1729_p6), %s1386_s24, 4294967168  ;;  %p25_p10 = scmp.ge.s32.totalorder %s2203_s25, 4   ;;  %s2535_s27 = smov %s2019_s28 }
 0x85f   : > { %s2536_s28 = smov %s2023_s29  ;;  %s2537_s29 = smov %s2234_s19 }
 0x860   : > { %s2538_s30 = smov %s2203_s25  ;;  %27 = sbr.rel (!%p25_p10) target bundleno = 12 (0xc), region = 122 }
 0x867   :  { %1391 = vsyncpa [#allocation3], 1 }
 0x868   :  { %1393 = vsyncpa [#allocation3 + $0x1], 1 }
 0x869   :  { %1394 = vsyncpa [#allocation6], 1 }
 0x86a   :  { %1396 = vsyncpa [#allocation6 + $0x1], 1 }
 0x86b   :  { %1397 = vsyncpa [#allocation9], 1 }
 0x86c   :  { %1398 = vsyncpa [#allocation4], 1 }
 0x86d   :  { %1400 = vsyncpa [#allocation4 + $0x1], 1 }

</bundles_post_ra>
